<compile_context>
chip_gen: v7x
topology: tpu7x:2x2x1
jax: 0.10.0
libtpu: 0.0.40
codegen_flags: <defaults>
</compile_context>

<pallas_src>
import functools

import jax
import jax.numpy as jnp
from jax import lax
from jax.experimental import pallas as pl
from jax.experimental.pallas import tpu as pltpu


def _round_up(v, m):
    return (v + m - 1) // m * m


def _embed_kernel(x_ref, ct_ref, csq_ref, o_ref, xc_acc, xsq_acc, *,
                  distance, eps):
    """Grid = (L, B-tiles, K-tiles, D-tiles); D (last axis) is the reduction.

    NOTE: the xsq hoist (computed only at ki==0) and the d==0 / d==last
    accumulator protocol require the K-tile and D axes to stay sequential
    ("arbitrary"); do not mark them parallel.
    """
    ki = pl.program_id(2)
    d = pl.program_id(3)
    nd = pl.num_programs(3)

    x = x_ref[0]                      # (tb, td), native dtype (bf16 or f32)
    ct = ct_ref[0]                    # (td, tk), native dtype

    @pl.when(d == 0)
    def _init():
        xc_acc[...] = jnp.zeros_like(xc_acc)

    @pl.when((d == 0) & (ki == 0))
    def _init_xsq():
        xsq_acc[...] = jnp.zeros_like(xsq_acc)

    # MXU: standard NN contraction (x @ c^T done via pre-transposed centroids).
    # Native-dtype operands, f32 accumulation.
    xc_acc[...] += lax.dot_general(
        x, ct, dimension_numbers=(((1,), (0,)), ((), ())),
        preferred_element_type=jnp.float32)

    # ||x||^2 depends only on the B tile: compute it once (first K tile only)
    # and reuse it for every subsequent K tile.  Cast sunk inside the pl.when
    # so ki>0 steps pay nothing.
    @pl.when(ki == 0)
    def _xsq():
        xf = x.astype(jnp.float32)
        xsq_acc[...] += jnp.sum(xf * xf, axis=-1, keepdims=True)

    @pl.when(d == nd - 1)
    def _finalize():
        xc = xc_acc[...]              # (tb, tk) f32
        x_sq = xsq_acc[...]           # (tb, 1)  f32
        c_sq = csq_ref[0]             # (1, tk)  f32 (precomputed in wrapper)
        if distance == "euclidean":
            # ||x-c||^2 = ||x||^2 + ||c||^2 - 2 x.c ; clamp guards fp
            # cancellation when x ~= c (accumulation is f32 throughout).
            sq = jnp.maximum(x_sq + c_sq - 2.0 * xc, 0.0)
            o_ref[0] = jnp.sqrt(sq).astype(o_ref.dtype)
        else:  # cosine — clamp each norm to eps (matches F.cosine_similarity)
            x_n = jnp.maximum(jnp.sqrt(x_sq), eps)
            c_n = jnp.maximum(jnp.sqrt(c_sq), eps)
            o_ref[0] = (xc / (x_n * c_n)).astype(o_ref.dtype)


def embedder_forward(x, centroids, distance="euclidean", *,
                     block_b=256, block_k=512, block_d=2048):
    """x: (L, B, D), centroids: (L, K, D) -> (L, B, K) float32."""
    if distance not in ("euclidean", "cosine"):
        raise ValueError(f"unknown distance: {distance}")

    L, B, D = x.shape
    Lc, K, Dc = centroids.shape
    assert L == Lc and D == Dc

    # Sublane granularity depends on dtype packing (f32: 8, bf16: 16, i8: 32).
    sub = max(8, 32 // jnp.dtype(x.dtype).itemsize)

    # Tile sizes: MXU / lane friendly, never larger than the padded array.
    tb = min(block_b, _round_up(B, sub))
    tk = min(block_k, _round_up(K, 128))      # lane-dense output stores
    td = min(block_d, _round_up(D, 128))

    # Guarantee >= 2 parallel (L x B-tile) grid tiles when possible so both
    # v7x TensorCores get work (L and B-tile axes are "parallel").
    if L == 1:
        while tb > sub and _round_up(B, tb) // tb < 2:
            tb = _round_up(tb // 2, sub)

    bp, kp, dp = _round_up(B, tb), _round_up(K, tk), _round_up(D, td)
    if (bp, dp) != (B, D):
        x = jnp.pad(x, ((0, 0), (0, bp - B), (0, dp - D)))
    if (kp, dp) != (K, D):
        centroids = jnp.pad(centroids, ((0, 0), (0, kp - K), (0, dp - D)))

    # Constant-side preprocessing (centroids are loaded once from h5 in the
    # original module, so this is amortized / free at steady state):
    #   * ||c||^2 per centroid, f32, shaped (L, 1, Kp).
    #   * centroids transposed to (L, Dp, Kp) so the kernel runs a plain NN
    #     contraction with no per-tile relayout.
    c_sq = jnp.sum(centroids.astype(jnp.float32) ** 2, axis=-1)[:, None, :]
    c_t = jnp.transpose(centroids, (0, 2, 1))

    grid = (L, bp // tb, kp // tk, dp // td)

    # VMEM budget: double-buffered input/output tiles + f32 accumulators
    # (scratch last-dim pads to 128 lanes).  Cap with headroom below the
    # physical per-core VMEM (64 MiB on v7x, 128 MiB on v5e/v6e).
    itemsize = jnp.dtype(x.dtype).itemsize
    vmem_est = (2 * (tb * td + td * tk) * itemsize   # x, c_t (double-buffered)
                + 2 * tk * 4                         # c_sq
                + 2 * tb * tk * 4                    # output
                + (tb * tk + tb * 128) * 4)          # accumulators
    try:
        vmem_cap = int(getattr(pltpu.get_tpu_info(), "vmem_capacity_bytes",
                               64 * 1024 * 1024))
    except Exception:
        vmem_cap = 64 * 1024 * 1024
    vmem_limit = int(min(vmem_cap - 12 * 1024 * 1024,
                         max(32 * 1024 * 1024, 2 * vmem_est)))

    kernel = functools.partial(_embed_kernel, distance=distance, eps=1e-8)

    out = pl.pallas_call(
        kernel,
        out_shape=jax.ShapeDtypeStruct((L, bp, kp), jnp.float32),
        grid_spec=pltpu.PrefetchScalarGridSpec(
            num_scalar_prefetch=0,
            grid=grid,
            in_specs=[
                pl.BlockSpec((1, tb, td), lambda l, bi, ki, d: (l, bi, d)),
                pl.BlockSpec((1, td, tk), lambda l, bi, ki, d: (l, d, ki)),
                pl.BlockSpec((1, 1, tk), lambda l, bi, ki, d: (l, 0, ki)),
            ],
            out_specs=pl.BlockSpec((1, tb, tk),
                                   lambda l, bi, ki, d: (l, bi, ki)),
            scratch_shapes=[
                pltpu.VMEM((tb, tk), jnp.float32),   # x.c accumulator
                pltpu.VMEM((tb, 1), jnp.float32),    # ||x||^2 accumulator
            ],
        ),
        compiler_params=pltpu.CompilerParams(
            # L and B tiles shard across TensorCores (megacore); K tiles MUST
            # stay sequential (x_sq hoist) and D is the reduction axis.
            dimension_semantics=("parallel", "parallel",
                                 "arbitrary", "arbitrary"),
            vmem_limit_bytes=vmem_limit,
        ),
    )(x, c_t, c_sq)

    return out[:, :B, :K]


def _reference(x, centroids, distance):
    # Pure-JAX reference mirroring the PyTorch module.
    def per_layer(xl, cl):
        if distance == "euclidean":
            diff = xl[:, None, :] - cl[None, :, :]              # (B, K, D)
            return jnp.sqrt(jnp.sum(diff * diff, axis=-1))
        eps = 1e-8
        xn = jnp.maximum(jnp.linalg.norm(xl, axis=-1, keepdims=True), eps)
        cn = jnp.maximum(jnp.linalg.norm(cl, axis=-1, keepdims=True), eps)
        return (xl @ cl.T) / (xn * cn.T)

    return jnp.stack([per_layer(x[l], centroids[l]) for l in range(x.shape[0])])


if __name__ == "__main__":
    key = jax.random.PRNGKey(0)

    # Small, module-consistent shapes: L layers of flattened activations.
    # TODO(synk): real centroids come from an h5 file; synthetic stand-ins here.
    shape_sets = [
        dict(L=2, B=20, K=10, D=200),     # single K tile (typical path)
        dict(L=1, B=16, K=200, D=160),    # multi K-tile + L==1 parallel split
    ]
    tile_sets = [
        {},                                          # tuned defaults
        dict(block_b=8, block_k=128, block_d=128),   # multi-tile / padding path
    ]

    ok = True
    for s in shape_sets:
        L, B, K, D = s["L"], s["B"], s["K"], s["D"]
        kx, kc, key = jax.random.split(key, 3)
        x = jax.random.normal(kx, (L, B, D), dtype=jnp.float32)
        centroids = jax.random.normal(kc, (L, K, D), dtype=jnp.float32)
        ref = {d: _reference(x, centroids, d) for d in ("euclidean", "cosine")}
        for dist in ("euclidean", "cosine"):
            for blocks in tile_sets:
                out = embedder_forward(x, centroids, distance=dist, **blocks)
                out = jax.block_until_ready(out)
                if out.shape != (L, B, K):
                    ok = False
                if not jnp.allclose(out, ref[dist], atol=1e-4, rtol=1e-4):
                    ok = False

    if ok:
        print("KERNEL_OK")
</pallas_src>

<mosaic_0001>
module attributes {stable_mosaic.version = 11 : i64} {
  func.func @_embed_kernel(%arg0: i32, %arg1: i32, %arg2: i32, %arg3: i32, %arg4: memref<1x24x256xf32, #tpu.memory_space<vmem>>, %arg5: memref<1x256x128xf32, #tpu.memory_space<vmem>>, %arg6: memref<1x1x128xf32, #tpu.memory_space<vmem>>, %arg7: memref<1x24x128xf32, #tpu.memory_space<vmem>>, %arg8: memref<24x128xf32, #tpu.memory_space<vmem>>, %arg9: memref<24x1xf32, #tpu.memory_space<vmem>>) attributes {dimension_semantics = [#tpu.dimension_semantics<parallel>, #tpu.dimension_semantics<parallel>, #tpu.dimension_semantics<arbitrary>, #tpu.dimension_semantics<arbitrary>], iteration_bounds = array<i64: 2, 1, 1, 1>, scalar_prefetch = 0 : i64, scratch_operands = 2 : i64, tpu.core_type = #tpu.core_type<tc>, window_params = [{transform_indices = @transform_0, window_bounds = array<i64: 1, 24, 256>}, {transform_indices = @transform_1, window_bounds = array<i64: 1, 256, 128>}, {transform_indices = @transform_2, window_bounds = array<i64: 1, 1, 128>}, {transform_indices = @transform_3, window_bounds = array<i64: 1, 24, 128>}]} {
    %c0 = arith.constant 0 : index
    %c0_0 = arith.constant 0 : index
    %c0_1 = arith.constant 0 : index
    %0 = vector.load %arg4[%c0, %c0_0, %c0_1] : memref<1x24x256xf32, #tpu.memory_space<vmem>>, vector<1x24x256xf32>
    %1 = vector.shape_cast %0 : vector<1x24x256xf32> to vector<24x256xf32>
    %c0_2 = arith.constant 0 : index
    %c0_3 = arith.constant 0 : index
    %c0_4 = arith.constant 0 : index
    %2 = vector.load %arg5[%c0_2, %c0_3, %c0_4] : memref<1x256x128xf32, #tpu.memory_space<vmem>>, vector<1x256x128xf32>
    %3 = vector.shape_cast %2 : vector<1x256x128xf32> to vector<256x128xf32>
    %c0_i32 = arith.constant 0 : i32
    %4 = arith.cmpi eq, %arg3, %c0_i32 : i32
    %5 = arith.extui %4 : i1 to i32
    %c0_i32_5 = arith.constant 0 : i32
    %6 = arith.cmpi ne, %5, %c0_i32_5 : i32
    scf.if %6 {
      %cst_17 = arith.constant 0.000000e+00 : f32
      %22 = vector.broadcast %cst_17 : f32 to vector<24x128xf32>
      %c0_18 = arith.constant 0 : index
      %c0_19 = arith.constant 0 : index
      %23 = vector.load %arg8[%c0_18, %c0_19] : memref<24x128xf32, #tpu.memory_space<vmem>>, vector<24x128xf32>
      tpu.vector_store %arg8[%c0_18, %c0_19], %22 {strides = array<i32>} : memref<24x128xf32, #tpu.memory_space<vmem>>, vector<24x128xf32>,
    } else {
    }
    %c0_i32_6 = arith.constant 0 : i32
    %7 = arith.cmpi eq, %arg3, %c0_i32_6 : i32
    %c0_i32_7 = arith.constant 0 : i32
    %8 = arith.cmpi eq, %arg2, %c0_i32_7 : i32
    %9 = arith.andi %7, %8 : i1
    %10 = arith.extui %9 : i1 to i32
    %c0_i32_8 = arith.constant 0 : i32
    %11 = arith.cmpi ne, %10, %c0_i32_8 : i32
    scf.if %11 {
      %cst_17 = arith.constant 0.000000e+00 : f32
      %22 = vector.broadcast %cst_17 : f32 to vector<24x1xf32>
      %c0_18 = arith.constant 0 : index
      %c0_19 = arith.constant 0 : index
      %23 = vector.load %arg9[%c0_18, %c0_19] : memref<24x1xf32, #tpu.memory_space<vmem>>, vector<24x1xf32>
      tpu.vector_store %arg9[%c0_18, %c0_19], %22 {strides = array<i32>} : memref<24x1xf32, #tpu.memory_space<vmem>>, vector<24x1xf32>,
    } else {
    }
    %c0_9 = arith.constant 0 : index
    %c0_10 = arith.constant 0 : index
    %12 = vector.load %arg8[%c0_9, %c0_10] : memref<24x128xf32, #tpu.memory_space<vmem>>, vector<24x128xf32>
    %cst = arith.constant dense<0.000000e+00> : vector<24x128xf32>
    %13 = tpu.matmul %1, %3, %cst {dimension_numbers = #tpu.dot_dimension_numbers<[1], [0], [0], [1], [0, 0, 1, 1], [], []>} : vector<24x256xf32>, vector<256x128xf32>, vector<24x128xf32> -> vector<24x128xf32>
    %14 = arith.addf %12, %13 : vector<24x128xf32>
    %c0_11 = arith.constant 0 : index
    %c0_12 = arith.constant 0 : index
    %15 = vector.load %arg8[%c0_11, %c0_12] : memref<24x128xf32, #tpu.memory_space<vmem>>, vector<24x128xf32>
    tpu.vector_store %arg8[%c0_11, %c0_12], %14 {strides = array<i32>} : memref<24x128xf32, #tpu.memory_space<vmem>>, vector<24x128xf32>,
    %c0_i32_13 = arith.constant 0 : i32
    %16 = arith.cmpi eq, %arg2, %c0_i32_13 : i32
    %17 = arith.extui %16 : i1 to i32
    %c0_i32_14 = arith.constant 0 : i32
    %18 = arith.cmpi ne, %17, %c0_i32_14 : i32
    scf.if %18 {
      %c0_17 = arith.constant 0 : index
      %c0_18 = arith.constant 0 : index
      %22 = vector.load %arg9[%c0_17, %c0_18] : memref<24x1xf32, #tpu.memory_space<vmem>>, vector<24x1xf32>
      %23 = arith.mulf %1, %1 : vector<24x256xf32>
      %cst_19 = arith.constant dense<0.000000e+00> : vector<24xf32>
      %24 = vector.multi_reduction <add>, %23, %cst_19 [1] : vector<24x256xf32> to vector<24xf32>
      %25 = vector.shape_cast %24 : vector<24xf32> to vector<24x1xf32>
      %26 = arith.addf %22, %25 : vector<24x1xf32>
      %c0_20 = arith.constant 0 : index
      %c0_21 = arith.constant 0 : index
      %27 = vector.load %arg9[%c0_20, %c0_21] : memref<24x1xf32, #tpu.memory_space<vmem>>, vector<24x1xf32>
      tpu.vector_store %arg9[%c0_20, %c0_21], %26 {strides = array<i32>} : memref<24x1xf32, #tpu.memory_space<vmem>>, vector<24x1xf32>,
    } else {
    }
    %c0_i32_15 = arith.constant 0 : i32
    %19 = arith.cmpi eq, %arg3, %c0_i32_15 : i32
    %20 = arith.extui %19 : i1 to i32
    %c0_i32_16 = arith.constant 0 : i32
    %21 = arith.cmpi ne, %20, %c0_i32_16 : i32
    scf.if %21 {
      %c0_17 = arith.constant 0 : index
      %c0_18 = arith.constant 0 : index
      %22 = vector.load %arg8[%c0_17, %c0_18] : memref<24x128xf32, #tpu.memory_space<vmem>>, vector<24x128xf32>
      %c0_19 = arith.constant 0 : index
      %c0_20 = arith.constant 0 : index
      %23 = vector.load %arg9[%c0_19, %c0_20] : memref<24x1xf32, #tpu.memory_space<vmem>>, vector<24x1xf32>
      %c0_21 = arith.constant 0 : index
      %c0_22 = arith.constant 0 : index
      %c0_23 = arith.constant 0 : index
      %24 = vector.load %arg6[%c0_21, %c0_22, %c0_23] : memref<1x1x128xf32, #tpu.memory_space<vmem>>, vector<1x1x128xf32>
      %25 = vector.shape_cast %24 : vector<1x1x128xf32> to vector<1x128xf32>
      %26 = vector.broadcast %23 : vector<24x1xf32> to vector<24x128xf32>
      %27 = vector.broadcast %25 : vector<1x128xf32> to vector<24x128xf32>
      %28 = arith.addf %26, %27 : vector<24x128xf32>
      %cst_24 = arith.constant 2.000000e+00 : f32
      %29 = vector.broadcast %cst_24 : f32 to vector<24x128xf32>
      %30 = arith.mulf %29, %22 : vector<24x128xf32>
      %31 = arith.subf %28, %30 : vector<24x128xf32>
      %cst_25 = arith.constant 0.000000e+00 : f32
      %32 = vector.broadcast %cst_25 : f32 to vector<24x128xf32>
      %33 = arith.maximumf %31, %32 : vector<24x128xf32>
      %34 = math.sqrt %33 : vector<24x128xf32>
      %c0_26 = arith.constant 0 : index
      %c0_27 = arith.constant 0 : index
      %c0_28 = arith.constant 0 : index
      %35 = vector.load %arg7[%c0_26, %c0_27, %c0_28] : memref<1x24x128xf32, #tpu.memory_space<vmem>>, vector<1x24x128xf32>
      %36 = vector.shape_cast %35 : vector<1x24x128xf32> to vector<24x128xf32>
      %37 = vector.shape_cast %34 : vector<24x128xf32> to vector<1x24x128xf32>
      tpu.vector_store %arg7[%c0_26, %c0_27, %c0_28], %37 {strides = array<i32>} : memref<1x24x128xf32, #tpu.memory_space<vmem>>, vector<1x24x128xf32>,
    } else {
    }
    return
  }
  func.func @transform_0(%arg0: i32, %arg1: i32, %arg2: i32, %arg3: i32) -> (i32, i32, i32) {
    %c0_i32 = arith.constant 0 : i32
    return %arg0, %arg1, %arg3 : i32, i32, i32
  }
  func.func @transform_1(%arg0: i32, %arg1: i32, %arg2: i32, %arg3: i32) -> (i32, i32, i32) {
    %c0_i32 = arith.constant 0 : i32
    return %arg0, %arg3, %arg2 : i32, i32, i32
  }
  func.func @transform_2(%arg0: i32, %arg1: i32, %arg2: i32, %arg3: i32) -> (i32, i32, i32) {
    %c0_i32 = arith.constant 0 : i32
    %c0_i32_0 = arith.constant 0 : i32
    return %arg0, %c0_i32, %arg2 : i32, i32, i32
  }
  func.func @transform_3(%arg0: i32, %arg1: i32, %arg2: i32, %arg3: i32) -> (i32, i32, i32) {
    %c0_i32 = arith.constant 0 : i32
    return %arg0, %arg1, %arg2 : i32, i32, i32
  }
}

</mosaic_0001>

<bundles_post_ra>
// kernel: tpu_custom_call.1
= control target key start
LH: loop header
LB: loop body
LE: loop exit
PB: predicated region body
PF: predicated region fallthrough
CT: control target
= control target key end

     0   :  { %8 = vsyncpa [#allocation5], 0  ;;  %s1356_s0 = inlined_call_operand.hbm [shape: f32[2,24,256], index: 0, kind: input, shape index: {}]   ;;  %s1357_s1 = inlined_call_operand.hbm [shape: f32[2,256,128], index: 1, kind: input, shape index: {}]   ;;  %s1358_s2 = inlined_call_operand.vmem [shape: f32[2,1,128], index: 2, kind: input, shape index: {}]   ;;  %s1359_s3 = inlined_call_operand.hbm [shape: f32[2,24,128], index: 3, kind: output, shape index: {}]  }
   0x1   :  { %10 = vsyncpa [#allocation5 + $0x1], 0 }
   0x2   :  { %11 = vsyncpa [#allocation8], 0 }
   0x3   :  { %13 = vsyncpa [#allocation8 + $0x1], 0 }
   0x4   :  { %14 = vsyncpa [#allocation6], 0 }
   0x5   :  { %16 = vsyncpa [#allocation6 + $0x1], 0  ;;  %s1065_s12 = smov 0   ;;  %s1067_s13 = smov 0  }
   0x6   :  { %s1069_s14 = smov 0   ;;  %s1071_s15 = smov 0  }
   0x7   :  { %s1073_s16 = smov 0   ;;  %s1075_s17 = smov 0  }
   0x8 LB: > { %s694_s18 = sadd.s32 4294967295, %s1032_s17   ;;  %s695_s19 = sadd.s32 4294967294, %s1032_s17   ;;  %s1032_s17 = sphi %s1075_s17, %s22_s17   ;;  %s1028_s16 = sphi %s1073_s16, %s1377_s16   ;;  %s1024_s15 = sphi %s1071_s15, %s1376_s15   ;;  %s1020_s14 = sphi %s1069_s14, %s1375_s14   ;;  %s1016_s13 = sphi %s1067_s13, %s1374_s13   ;;  %s1012_s12 = sphi %s1065_s12, %s1373_s12  }
   0x9   : > { %s48_s20 = sadd.s32 1, %s1028_s16  ;;  %s59_s21 = sadd.s32 1, %s1020_s14 }
   0xa   : > { %p50_p0 = scmp.ge.s32.totalorder %s48_s20, 2  ;;  %p66_p1 = scmp.ne.s32.totalorder %s1020_s14, %s1016_s13 }
   0xb   : > { %p67_p2 = scmp.eq.s32.totalorder %s1032_s17, 0  ;;  %p72_p3 = scmp.ne.s32.totalorder %s1016_s13, %s1012_s12 }
   0xc   : > { %s1379_s20 = smov (%p50_p0, %s48_s20), 0  ;;  %p73_p5 = scmp.eq.s32.totalorder %s694_s18, 0 }
   0xd   : > { %p1106_p4 = por %p67_p2, %p66_p1  ;;  %s52_s23 = ssub.s32 %s1028_s16, %s1379_s20 }
   0xe   : > { %p158_p6 = scmp.eq.s32.totalorder %s694_s18, 1  ;;  %p57_p7 = scmp.eq.s32.totalorder %s52_s23, 0 }
   0xf   : > { %p1112_p8 = por %p73_p5, %p72_p3  ;;  %p164_p10 = scmp.eq.s32.totalorder %s695_s19, 1 }
  0x10   : > { %p1116_p9 = por %p158_p6, %p66_p1  ;;  %p820_p13 = scmp.lt.s32.totalorder %s1032_s17, 2 }
  0x11   : > { %s1363_s24 = scalar_select %p1112_p8, 1, 0 }
  0x12   : > { %s1364_s25 = scalar_select %p1116_p9, 1, 0 }
  0x13   : > { %s1121_s26 = scalar_select %p57_p7, %s1020_s14, %s59_s21  }
  0x14   : > { %p1123_p11 = por %p164_p10, %p72_p3  ;;  %s1130_s28 = sand.u32 1, %s1020_s14  }
  0x15   : > { %s798_s29 = smul.u32 48, %s1130_s28  ;;  %p1136_p0 = pnand %p820_p13, %p1106_p4 }
  0x16   : > { %s1365_s27 = scalar_select %p1123_p11, 1, 0 }
  0x17   : > { %s799_s30 = smul.u32 768, %s1028_s16  ;;  %s188_s8 = scalar_lea.vmem [#allocation4], %s798_s29 }
  0x18   : > { %s200_s9 = sshll.u32 %s188_s8, 4  ;;  %s185_s10 = scalar_lea.sflag [#allocation5], %s1130_s28  ;;  %s1145_s9 = int_to_ptr.vmem [resolvable:$true] %s200_s9 }
  0x19   : > { %s1143_s7 = scalar_lea.hbm %s1356_s0, %s799_s30  ;;  %p888_p3 = pneg %p1136_p0 }
  0x1a   : > { %s886_s11 = scalar_lea.hbm %s1143_s7, 768  ;;  %s891_s21 = scalar_lea.hbm %s1356_s0, 1536 }
  0x1b   : > { %p887_p2 = scmp.ne.s32.totalorder %s1143_s7, %s886_s11  ;;  %p892_p6 = scmp.lt.u32.totalorder %s1143_s7, %s1356_s0 }
  0x1c   : > { %p893_p7 = scmp.lt.u32.totalorder %s891_s21, %s886_s11  ;;  %p895_p13 = scmp.lt.u32.totalorder %s886_s11, %s1143_s7 }
  0x1d   : > { %p889_p4 = pnand %p888_p3, %p887_p2 }
  0x1e   : > { %p894_p10 = por %p893_p7, %p892_p6 }
  0x1f   : > { %p890_p5 = pneg %p889_p4 }
  0x20   : > { %p896_p12 = por %p895_p13, %p894_p10 }
  0x22   : > { %p897_p1 = pnand %p896_p12, %p890_p5 }
  0x24   : > { %900 = shalt.err (!%p897_p1)
}
  0x25   : > { %s901_s29 = scalar_lea.vmem %s1145_s9, 768  ;;  %s1034_s30 = smov [#allocation4]  }
  0x26   : > { %p902_p2 = scmp.ne.s32.totalorder %s1145_s9, %s901_s29  ;;  %s906_s5 = sshll.u32 %s1034_s30, 4  ;;  %s907_s5 = int_to_ptr.vmem [resolvable:$false] %s906_s5 }
  0x27   : > { %s908_s6 = scalar_lea.vmem %s907_s5, 1536  ;;  %p909_p9 = scmp.lt.s32.totalorder %s1145_s9, %s907_s5 }
  0x28   : > { %p904_p4 = pnand %p902_p2, %p888_p3  ;;  %p910_p6 = scmp.lt.s32.totalorder %s908_s6, %s901_s29 }
  0x2a   : > { %p905_p11 = pneg %p904_p4  ;;  %p911_p7 = por %p910_p6, %p909_p9 }
  0x2c   : > { %p912_p10 = pnand %p911_p7, %p905_p11 }
  0x2e   : > { %915 = shalt.err (!%p912_p10)
}
  0x2f   : > { %s1035_s8 = smov 256   ;;  %s1036_s11 = smov 16  }
  0x30   : > { %812 = dma.hbm_to_vmem [thread:$0]  (!%p1136_p0), %s1143_s7, 768, %s1145_s9, %s185_s10, %s1035_s8, %s1035_s8, %s1036_s11  }
  0x31   : > { %p241_p12 = scmp.lt.s32.totalorder %s1032_s17, 3  ;;  %s699_s18 = sshll.u32 %s1130_s28, 8 }
  0x32   : > { %s708_s19 = sshll.u32 %s1028_s16, 12  ;;  %p1367_p9 = scmp.ge.s32.totalorder %s1032_s17, 1 }
  0x33   : > { %s1188_s29 = scalar_lea.hbm %s1357_s1, %s708_s19  ;;  %s214_s30 = scalar_lea.vmem [#allocation7], %s699_s18 }
  0x34   : > { %p1181_p11 = pnand %p1367_p9, %p241_p12  ;;  %s224_s5 = sshll.u32 %s214_s30, 4  ;;  %s1190_s5 = int_to_ptr.vmem [resolvable:$true] %s224_s5 }
  0x35   : > { %s211_s7 = scalar_lea.sflag [#allocation8], %s1130_s28  ;;  %s916_s9 = scalar_lea.hbm %s1188_s29, 4096 }
  0x36   : > { %p917_p1 = scmp.ne.s32.totalorder %s1188_s29, %s916_s9  ;;  %s921_s8 = scalar_lea.hbm %s1357_s1, 8192 }
  0x37   : > { %p922_p2 = scmp.lt.u32.totalorder %s1188_s29, %s1357_s1  ;;  %p923_p4 = scmp.lt.u32.totalorder %s921_s8, %s916_s9 }
  0x38   : > { %p919_p5 = pnand %p917_p1, %p888_p3  ;;  %p925_p7 = scmp.lt.u32.totalorder %s916_s9, %s1188_s29 }
  0x39   : > { %p924_p6 = por %p923_p4, %p922_p2 }
  0x3a   : > { %p920_p13 = pneg %p919_p5 }
  0x3b   : > { %p926_p10 = por %p925_p7, %p924_p6 }
  0x3d   : > { %p927_p12 = pnand %p926_p10, %p920_p13 }
  0x3f   : > { %930 = shalt.err (!%p927_p12)
}
  0x40   : > { %s931_s18 = scalar_lea.vmem %s1190_s5, 4096  ;;  %s1037_s22 = smov [#allocation7]  }
  0x41   : > { %p932_p9 = scmp.ne.s32.totalorder %s1190_s5, %s931_s18  ;;  %s936_s23 = sshll.u32 %s1037_s22, 4  ;;  %s937_s23 = int_to_ptr.vmem [resolvable:$false] %s936_s23 }
  0x42   : > { %s938_s30 = scalar_lea.vmem %s937_s23, 8192  ;;  %p939_p8 = scmp.lt.s32.totalorder %s1190_s5, %s937_s23 }
  0x43   : > { %p934_p1 = pnand %p932_p9, %p888_p3  ;;  %p940_p2 = scmp.lt.s32.totalorder %s938_s30, %s931_s18 }
  0x45   : > { %p935_p5 = pneg %p934_p1  ;;  %p941_p4 = por %p940_p2, %p939_p8 }
  0x47   : > { %p942_p6 = pnand %p941_p4, %p935_p5 }
  0x49   : > { %945 = shalt.err (!%p942_p6)
}
  0x4a   : > { %s1038_s9 = smov 128   ;;  %s1039_s10 = smov 8  }
  0x4b   : > { %815 = dma.hbm_to_vmem [thread:$0]  (!%p1136_p0), %s1188_s29, 4096, %s1190_s5, %s211_s7, %s1038_s9, %s1038_s9, %s1039_s10  }
  0x4c   : > { %245 = sbr.rel (%p1181_p11) target bundleno = 413 (0x19d), region = 32  ;;  %s1221_s6 = sand.u32 (!%p1181_p11), 1, %s1016_s13  }
  0x4d   : > { %s800_s8 = smul.u32 (!%p1181_p11), 48, %s1221_s6  ;;  %s248_s11 = scalar_lea.sflag (!%p1181_p11), [#allocation5], %s1221_s6 }
  0x4e   : > { %p1369_p8 = scmp.ne.s32.totalorder (!%p1181_p11), %s1363_s24, 0 }
  0x4f   : > { %s251_s19 = scalar_lea.vmem (!%p1181_p11), [#allocation4], %s800_s8 }
  0x53   : > { %999 = dma.done.wait (%p1369_p8), %s248_s11, 768  }
  0x54   : > { %1001 = vsyncadd (%p1369_p8), %s248_s11, 4294966528  ;;  %s703_s28 = sshll.u32 %s1221_s6, 8  ;;  %s257_s4 = scalar_lea.sflag [#allocation8], %s1221_s6 }
  0x55   : > { %s1231_s21 = scalar_lea.vmem [#allocation7], %s703_s28 }
  0x56   : > { %1003 = dma.done.wait (%p1369_p8), %s257_s4, 4096  }
  0x57   : > { %1005 = vsyncadd (%p1369_p8), %s257_s4, 4294963200  ;;  %vm354_vm0 = vcmask 7168   ;;  %v1040_v0 = vmov 0.0   ;;  %v1240_v1 = vld [vmem:[%s251_s19] sm:$0xff]  ;;  %v305_v2 = vld [vmem:[%s251_s19 + $0x8] sm:$0xff]  ;;  %v1041_v59 = vmov 0  }
  0x58   : > { %355 = vst.msk [vmem:[#allocation3] sm:$0xff] %vm354_vm0, %v1040_v0  ;;  %356 = vst.msk [vmem:[#allocation3 + $0x8] sm:$0xff] %vm354_vm0, %v1040_v0  ;;  %v1242_v3 = vld [vmem:[%s251_s19 + $0x20] sm:$0xff]  ;;  %v453_v4 = vmul.f32 %v1240_v1, %v1240_v1  ;;  %v454_v5 = vmul.f32 %v305_v2, %v305_v2  ;;  %v1246_v6 = vld [vmem:[%s251_s19 + $0x28] sm:$0xff]  ;;  %425 = vmatprep.mubr.f32.mxu0 %v305_v2  ;;  %878 = vset.pattern.permute.xlu1 %v1041_v59  ;;  %p297_p0 = scmp.lt.s32.totalorder %s1024_s15, 1  ;;  %s801_s18 = smul.u32 24, %s1221_s6 }
  0x59   : > { %357 = vst.msk [vmem:[#allocation3 + $0x10] sm:$0xff] %vm354_vm0, %v1040_v0  ;;  %v457_v7 = vmul.f32 %v1242_v3, %v1242_v3  ;;  %v1250_v8 = vld [vmem:[%s251_s19 + $0x10] sm:$0xff]  ;;  %v307_v9 = vld [vmem:[%s251_s19 + $0x18] sm:$0xff]  ;;  %v458_v10 = vmul.f32 %v1246_v6, %v1246_v6  ;;  %879 = vset.pattern.permute.xlu0 %v1041_v59  ;;  %s802_s22 = smul.u32 384, %s1024_s15  ;;  %p1370_p11 = scmp.ne.s32.totalorder %s1364_s25, 0 }
  0x5a   : > { %v455_v11 = vmul.f32 %v1250_v8, %v1250_v8  ;;  %v456_v12 = vmul.f32 %v307_v9, %v307_v9  ;;  %v326_v13 = vld [vmem:[%s1231_s21 + $0x80] sm:$0xff]  ;;  %v327_v14 = vld [vmem:[%s1231_s21 + $0x88] sm:$0xff]  ;;  %430 = vmatprep.mubr.f32.mxu1 %v307_v9  ;;  %v459_v16 = vadd.f32 %v454_v5, %v453_v4  ;;  %v328_v19 = vld [vmem:[%s1231_s21 + $0x90] sm:$0xff]  ;;  %s298_s24 = scalar_select %p297_p0, %s1024_s15, 1 }
  0x5b   : > { %v310_v15 = vld [vmem:[%s1231_s21] sm:$0xff]  ;;  %v750_v17 = vpack.c.bf16 %v327_v14, %v326_v13  ;;  %v311_v18 = vld [vmem:[%s1231_s21 + $0x8] sm:$0xff]  ;;  %v329_v20 = vld [vmem:[%s1231_s21 + $0x98] sm:$0xff]  ;;  %v465_v21 = vadd.f32 %v458_v10, %v457_v7  ;;  %s293_s23 = scalar_lea.vmem [#allocation9], %s801_s18  ;;  %s1305_s8 = scalar_lea.hbm %s1359_s3, %s802_s22 }
  0x5c   : > { %v752_v22 = vpack.c.bf16 %v311_v18, %v310_v15  ;;  %v754_v23 = vpack.c.bf16 %v329_v20, %v328_v19  ;;  %v312_v24 = vld [vmem:[%s1231_s21 + $0x10] sm:$0xff]  ;;  %v313_v25 = vld [vmem:[%s1231_s21 + $0x18] sm:$0xff]  ;;  %460 = vadd.xlane.f32.xlu0 %v459_v16  ;;  %v462_v26 = vadd.f32 %v456_v12, %v455_v11  ;;  %v330_v27 = vld [vmem:[%s1231_s21 + $0xa0] sm:$0xff]  ;;  %s302_s7 = scalar_lea.vmem %s1358_s2, %s298_s24  ;;  %s559_s30 = sshll.u32 %s293_s23, 4  ;;  %s1307_s30 = int_to_ptr.vmem [resolvable:$true] %s559_s30 }
  0x5d   : > { %782 = vmatprep.subr.bf16.mxu1 %v750_v17  ;;  %v331_v28 = vld [vmem:[%s1231_s21 + $0xa8] sm:$0xff]  ;;  %466 = vadd.xlane.f32.xlu1 %v465_v21  ;;  %v756_v29 = vpack.c.bf16 %v313_v25, %v312_v24  ;;  %v314_v31 = vld [vmem:[%s1231_s21 + $0x20] sm:$0xff]  ;;  %v332_v33 = vld [vmem:[%s1231_s21 + $0xb0] sm:$0xff]  ;;  %s543_s15 = scalar_lea.sflag [#allocation6], %s1221_s6  ;;  %s946_s11 = scalar_lea.vmem %s1307_s30, 384 }
  0x5e   : > { %751 = vmatprep.subr.bf16.mxu0 %v750_v17  ;;  %790 = vmatpush3.bf16.msra.mxu1 %v752_v22  ;;  %v758_v30 = vpack.c.bf16 %v331_v28, %v330_v27  ;;  %v315_v32 = vld [vmem:[%s1231_s21 + $0x28] sm:$0xff]  ;;  %v333_v34 = vld [vmem:[%s1231_s21 + $0xb8] sm:$0xff]  ;;  %v316_v37 = vld [vmem:[%s1231_s21 + $0x30] sm:$0xff]  ;;  %p947_p3 = scmp.ne.s32.totalorder %s1307_s30, %s946_s11  ;;  %s1042_s19 = smov [#allocation9]  }
  0x5f   : > { %753 = vmatpush3.bf16.msra.mxu0 %v752_v22  ;;  %783 = vmatprep.subr.bf16.mxu1 %v754_v23  ;;  %v760_v35 = vpack.c.bf16 %v315_v32, %v314_v31  ;;  %v762_v36 = vpack.c.bf16 %v333_v34, %v332_v33  ;;  %v317_v38 = vld [vmem:[%s1231_s21 + $0x38] sm:$0xff]  ;;  %v334_v39 = vld [vmem:[%s1231_s21 + $0xc0] sm:$0xff]  ;;  %v335_v40 = vld [vmem:[%s1231_s21 + $0xc8] sm:$0xff]  ;;  %s950_s28 = sshll.u32 %s1042_s19, 4  ;;  %s951_s28 = int_to_ptr.vmem [resolvable:$false] %s950_s28 }
  0x60   : > { %755 = vmatprep.subr.bf16.mxu0 %v754_v23  ;;  %463 = vadd.xlane.f32.xlu0 %v462_v26  ;;  %v764_v41 = vpack.c.bf16 %v317_v38, %v316_v37  ;;  %v766_v42 = vpack.c.bf16 %v335_v40, %v334_v39  ;;  %v318_v43 = vld [vmem:[%s1231_s21 + $0x40] sm:$0xff]  ;;  %v319_v44 = vld [vmem:[%s1231_s21 + $0x48] sm:$0xff]  ;;  %v336_v45 = vld [vmem:[%s1231_s21 + $0xd0] sm:$0xff]  ;;  %p948_p13 = pnand %p947_p3, %p1370_p11  ;;  %s952_s4 = scalar_lea.vmem %s951_s28, 768 }
  0x61   : > { %v337_v46 = vld [vmem:[%s1231_s21 + $0xd8] sm:$0xff]  ;;  %v768_v47 = vpack.c.bf16 %v319_v44, %v318_v43  ;;  %v320_v49 = vld [vmem:[%s1231_s21 + $0x50] sm:$0xff]  ;;  %v338_v51 = vld [vmem:[%s1231_s21 + $0xe0] sm:$0xff]  ;;  %p953_p10 = scmp.lt.s32.totalorder %s1307_s30, %s951_s28  ;;  %p954_p12 = scmp.lt.s32.totalorder %s952_s4, %s946_s11 }
  0x62   : > { %791 = vmatpush3.bf16.msra.mxu1 %v756_v29  ;;  %v770_v48 = vpack.c.bf16 %v337_v46, %v336_v45  ;;  %v321_v50 = vld [vmem:[%s1231_s21 + $0x58] sm:$0xff]  ;;  %v339_v52 = vld [vmem:[%s1231_s21 + $0xe8] sm:$0xff]  ;;  %v322_v55 = vld [vmem:[%s1231_s21 + $0x60] sm:$0xff]  ;;  %p949_p7 = pneg %p948_p13 }
  0x63   : > { %757 = vmatpush3.bf16.msra.mxu0 %v756_v29  ;;  %784 = vmatprep.subr.bf16.mxu1 %v758_v30  ;;  %v772_v53 = vpack.c.bf16 %v321_v50, %v320_v49  ;;  %v774_v54 = vpack.c.bf16 %v339_v52, %v338_v51  ;;  %v323_v56 = vld [vmem:[%s1231_s21 + $0x68] sm:$0xff]  ;;  %v340_v57 = vld [vmem:[%s1231_s21 + $0xf0] sm:$0xff]  ;;  %v341_v58 = vld [vmem:[%s1231_s21 + $0xf8] sm:$0xff]  ;;  %p955_p9 = por %p954_p12, %p953_p10 }
  0x64   : > { %759 = vmatprep.subr.bf16.mxu0 %v758_v30  ;;  %v776_v60 = vpack.c.bf16 %v323_v56, %v322_v55  ;;  %v778_v61 = vpack.c.bf16 %v341_v58, %v340_v57  ;;  %v324_v62 = vld [vmem:[%s1231_s21 + $0x70] sm:$0xff]  ;;  %v325_v63 = vld [vmem:[%s1231_s21 + $0x78] sm:$0xff]  ;;  %v450_v2 = vld [vmem:[#allocation3] sm:$0xff] }
  0x65   : > { %v780_v0 = vpack.c.bf16 %v325_v63, %v324_v62  ;;  %v452_v4 = vld [vmem:[#allocation3 + $0x10] sm:$0xff]  ;;  %v451_v11 = vld [vmem:[#allocation3 + $0x8] sm:$0xff]  ;;  %v704_v22 = vld [vmem:[%s302_s7] ss:$0 sm:$0xff]  ;;  %p956_p1 = pnand %p955_p9, %p949_p7 }
  0x66   : > { %792 = vmatpush3.bf16.msra.mxu1 %v760_v35 }
  0x67   : > { %761 = vmatpush3.bf16.msra.mxu0 %v760_v35  ;;  %785 = vmatprep.subr.bf16.mxu1 %v762_v36 }
  0x68   : > { %763 = vmatprep.subr.bf16.mxu0 %v762_v36 }
  0x6a   : > { %793 = vmatpush3.bf16.msra.mxu1 %v764_v41 }
  0x6b   : > { %765 = vmatpush3.bf16.msra.mxu0 %v764_v41  ;;  %786 = vmatprep.subr.bf16.mxu1 %v766_v42 }
  0x6c   : > { %767 = vmatprep.subr.bf16.mxu0 %v766_v42 }
  0x6e   : > { %794 = vmatpush3.bf16.msra.mxu1 %v768_v47 }
  0x6f   : > { %769 = vmatpush3.bf16.msra.mxu0 %v768_v47  ;;  %787 = vmatprep.subr.bf16.mxu1 %v770_v48 }
  0x70   : > { %771 = vmatprep.subr.bf16.mxu0 %v770_v48 }
  0x72   : > { %795 = vmatpush3.bf16.msra.mxu1 %v772_v53 }
  0x73   : > { %773 = vmatpush3.bf16.msra.mxu0 %v772_v53  ;;  %788 = vmatprep.subr.bf16.mxu1 %v774_v54 }
  0x74   : > { %775 = vmatprep.subr.bf16.mxu0 %v774_v54 }
  0x76   : > { %796 = vmatpush3.bf16.msra.mxu1 %v776_v60 }
  0x77   : > { %777 = vmatpush3.bf16.msra.mxu0 %v776_v60  ;;  %789 = vmatprep.subr.bf16.mxu1 %v778_v61 }
  0x78   : > { %779 = vmatprep.subr.bf16.mxu0 %v778_v61 }
  0x7a   : > { %797 = vmatpush3.bf16.msra.mxu1 %v780_v0 }
  0x7b   : > { %781 = vmatpush3.bf16.msra.mxu0 %v780_v0 }
  0x7d   : > { %431 = vmatmul.mubr.f32.vlgmr.msra.gmra.mrb[0].mxu1 %v1250_v8 }
  0x7e   : > { %426 = vmatmul.mubr.f32.vlgmr.msra.gmra.mrb[0].mxu0 %v1240_v1  ;;  %435 = vmatprep.mubr.f32.mxu1 %v1246_v6 }
  0x81   : > { %436 = vmatmul.mubr.f32.gmra.mrb[2].mxu1 %v1242_v3 }
  0xe9   : > { %v461_v5 = vpop.xlane.xlu0 %460 }
  0xea   : > { %v468_v7 = vadd.f32 %v461_v5, %v450_v2  ;;  %v467_v9 = vpop.xlane.xlu1 %466 }
  0xeb   : > { %v470_v10 = vadd.f32 %v467_v9, %v452_v4 }
  0xec   : > { %472 = vst.msk [vmem:[#allocation3] sm:$0xff] %vm354_vm0, %v468_v7 }
  0xed   : > { %474 = vst.msk [vmem:[#allocation3 + $0x10] sm:$0xff] %vm354_vm0, %v470_v10  ;;  %v464_v12 = vpop.xlane.xlu0 %463 }
  0xee   : > { %v469_v13 = vadd.f32 %v464_v12, %v451_v11 }
  0xf0   : > { %473 = vst.msk [vmem:[#allocation3 + $0x8] sm:$0xff] %vm354_vm0, %v469_v13 }
  0xf3   : > { %v481_v1 = vld [vmem:[#allocation3] sm:$0xff] }
  0xf4   : > { %487 = vperm.xlu1 %878, %v481_v1   ;;  %v483_v3 = vld [vmem:[#allocation3 + $0x10] sm:$0xff] }
  0xf7   : > { %v482_v6 = vld [vmem:[#allocation3 + $0x8] sm:$0xff] }
  0xf8   : > { %497 = vperm.xlu1 %878, %v483_v3   ;;  %492 = vperm.xlu0 %879, %v482_v6  }
 0x150   : > { %v744_v8 = vpop.f32.mrb[0].mxu1 }
 0x151   : > { %v741_v14 = vpop.f32.mrb[0].mxu0  ;;  %v745_v15 = vpop.f32.mrb[1].mxu1 }
 0x152   : > { %v742_v16 = vpop.f32.mrb[1].mxu0  ;;  %v746_v17 = vadd.f32 %v745_v15, %v744_v8 }
 0x153   : > { %v743_v18 = vadd.f32 %v742_v16, %v741_v14 }
 0x154   : > { %v747_v19 = vpop.f32.mrb[2].mxu1  ;;  %v510_v33 = vmul.f32 2.0, %v746_v17 }
 0x155   : > { %v748_v20 = vpop.f32.mrb[3].mxu1  ;;  %v509_v23 = vmul.f32 2.0, %v743_v18 }
 0x156   : > { %v749_v21 = vadd.f32 %v748_v20, %v747_v19 }
 0x158   : > { %v511_v27 = vmul.f32 2.0, %v749_v21 }
 0x173   : > { %v488_v24 = vpop.permute.xlu1 %487 }
 0x174   : > { %v506_v25 = vadd.f32 %v704_v22, %v488_v24 }
 0x176   : > { %v512_v26 = vsub.f32 %v506_v25, %v509_v23 }
 0x177   : > { %v498_v28 = vpop.permute.xlu1 %497  ;;  %v493_v29 = vpop.permute.xlu0 %492 }
 0x178   : > { %v515_v30 = vmax.f32 %v512_v26, 0.0  ;;  %v508_v31 = vadd.f32 %v704_v22, %v498_v28  ;;  %v507_v32 = vadd.f32 %v704_v22, %v493_v29 }
 0x17a   : > { %880 = vrsqrt.f32 %v515_v30  ;;  %v514_v34 = vsub.f32 %v508_v31, %v511_v27  ;;  %v513_v35 = vsub.f32 %v507_v32, %v510_v33  ;;  %vm520_vm1 = vcmp.eq.f32.partialorder %v515_v30, inf }
 0x17b   : > { %v523_v40 = vand.u32 2147483648, %v515_v30  ;;  %vm522_vm2 = vcmp.eq.f32.partialorder %v515_v30, 0.0 }
 0x17c   : > { %v517_v36 = vmax.f32 %v514_v34, 0.0  ;;  %v516_v37 = vmax.f32 %v513_v35, 0.0 }
 0x17e   : > { %882 = vrsqrt.f32 %v517_v36  ;;  %vm534_vm3 = vcmp.eq.f32.partialorder %v517_v36, inf  ;;  %v537_v46 = vand.u32 2147483648, %v517_v36  ;;  %vm536_vm4 = vcmp.eq.f32.partialorder %v517_v36, 0.0 }
 0x17f   : > { %884 = vrsqrt.f32 %v516_v37  ;;  %vm527_vm5 = vcmp.eq.f32.partialorder %v516_v37, inf  ;;  %v530_v49 = vand.u32 2147483648, %v516_v37  ;;  %vm529_vm6 = vcmp.eq.f32.partialorder %v516_v37, 0.0 }
 0x184   : > { %v881_v38 = vpop.eup %880 }
 0x185   : > { %v519_v39 = vmul.f32 %v881_v38, %v515_v30 }
 0x187   : > { %v521_v41 = vsel %vm520_vm1, %v515_v30, %v519_v39 }
 0x188   : > { %v524_v42 = vsel %vm522_vm2, %v523_v40, %v521_v41  ;;  %v883_v43 = vpop.eup %882 }
 0x189   : > { %539 = vst [vmem:[%s293_s23] sm:$0xff] %v524_v42  ;;  %v885_v44 = vpop.eup %884  ;;  %v533_v45 = vmul.f32 %v883_v43, %v517_v36 }
 0x18a   : > { %v526_v47 = vmul.f32 %v885_v44, %v516_v37 }
 0x18b   : > { %v535_v48 = vsel %vm534_vm3, %v517_v36, %v533_v45 }
 0x18c   : > { %v528_v50 = vsel %vm527_vm5, %v516_v37, %v526_v47  ;;  %v538_v51 = vsel %vm536_vm4, %v537_v46, %v535_v48 }
 0x18d   : > { %v531_v52 = vsel %vm529_vm6, %v530_v49, %v528_v50  ;;  %541 = vst [vmem:[%s293_s23 + $0x10] sm:$0xff] %v538_v51 }
 0x18e   : > { %540 = vst [vmem:[%s293_s23 + $0x8] sm:$0xff] %v531_v52 }
 0x18f   : > { %959 = shalt.err (!%p956_p1)
}
 0x190   : > { %s960_s21 = scalar_lea.hbm %s1305_s8, 384  ;;  %s964_s5 = scalar_lea.hbm %s1359_s3, 768 }
 0x191   : > { %p961_p5 = scmp.ne.s32.totalorder %s1305_s8, %s960_s21  ;;  %p965_p6 = scmp.lt.u32.totalorder %s1305_s8, %s1359_s3 }
 0x192   : > { %p966_p8 = scmp.lt.u32.totalorder %s964_s5, %s960_s21  ;;  %p968_p3 = scmp.lt.u32.totalorder %s960_s21, %s1305_s8 }
 0x193   : > { %p962_p2 = pnand %p961_p5, %p1370_p11 }
 0x194   : > { %p967_p0 = por %p966_p8, %p965_p6 }
 0x195   : > { %p963_p4 = pneg %p962_p2 }
 0x196   : > { %p969_p13 = por %p968_p3, %p967_p0 }
 0x198   : > { %p970_p7 = pnand %p969_p13, %p963_p4 }
 0x19a   : > { %973 = shalt.err (!%p970_p7)
}
 0x19b   : > { %s1043_s22 = smov 128   ;;  %s1044_s23 = smov 8  }
 0x19c   : > { %807 = dma.vmem_to_hbm [thread:$0]  (%p1370_p11), %s1307_s30, 384, %s1305_s8, %s543_s15, %s1043_s22, %s1043_s22, %s1044_s23  }
 0x19d PF: > { %s574_s9 = sand.u32 1, %s1012_s12   ;;  %p1371_p10 = scmp.ne.s32.totalorder %s1365_s27, 0 }
 0x19e   : > { %p1372_p12 = scmp.ge.s32.totalorder %s1032_s17, 2  ;;  %s575_s10 = scalar_lea.sflag [#allocation6], %s574_s9 }
 0x1a0   : > { %p817_p9 = pnand %p1372_p12, %p1371_p10 }
 0x1a2   : > { %1007 = dma.done.wait (!%p817_p9), %s575_s10, 384  }
 0x1a3   : > { %1009 = vsyncadd (!%p817_p9), %s575_s10, 4294966912  ;;  %s22_s17 = sadd.s32 1, %s1032_s17   ;;  %s1373_s12 = smov %s1016_s13 }
 0x1a4   : > { %p19_p1 = scmp.ge.s32.totalorder %s22_s17, 4   ;;  %s1374_s13 = smov %s1020_s14 }
 0x1a5   : > { %s1375_s14 = smov %s1121_s26  ;;  %s1376_s15 = smov %s1028_s16 }
 0x1a6   : > { %s1377_s16 = smov %s1379_s20  ;;  %21 = sbr.rel (!%p19_p1) target bundleno = 8 (0x8), region = 109 }
 0x1ad   :  { %580 = vsyncpa [#allocation5], 1 }
 0x1ae   :  { %582 = vsyncpa [#allocation5 + $0x1], 1 }
 0x1af   :  { %583 = vsyncpa [#allocation8], 1 }
 0x1b0   :  { %585 = vsyncpa [#allocation8 + $0x1], 1 }
 0x1b1   :  { %586 = vsyncpa [#allocation6], 1 }
 0x1b2   :  { %588 = vsyncpa [#allocation6 + $0x1], 1 }

</bundles_post_ra>
